<compile_context>
chip_gen: v7x
topology: tpu7x:2x2x1
jax: 0.10.0
libtpu: 0.0.40
codegen_flags: <defaults>
</compile_context>

<pallas_src>
import jax
import jax.numpy as jnp
from jax.experimental import pallas as pl
from jax.experimental.pallas import tpu as pltpu


def _round_up(x, m):
    return ((x + m - 1) // m) * m


def _cdiv(a, b):
    return (a + b - 1) // b


def _sublane_pack(dtype):
    # Rows per packed sublane tile: f32 -> 8, bf16 -> 16, int8/fp8 -> 32.
    return {4: 8, 2: 16, 1: 32}.get(jnp.dtype(dtype).itemsize, 8)


def _vmem_budget_bytes():
    # v5e/v6e: 128 MiB physical -> 96 MiB budget; v7x: 64 MiB -> 48 MiB budget.
    try:
        cap = int(pltpu.get_tpu_info().vmem_capacity_bytes)
    except Exception:
        cap = 64 * 1024 * 1024
    return max(32 * 1024 * 1024, int(0.75 * cap))


def _vmem_working_set(tm, tn, in_p, x_bytes, w_bytes, o_bytes):
    # Double-buffered x tile + weight slab + output tile, plus the small bias row.
    return 2 * (tm * in_p * x_bytes + in_p * tn * w_bytes + tm * tn * o_bytes) + 2 * tn * 4


def _pick_tn(out_feat, tn_target):
    """Lane tile: multiple of 128 covering out_feat with minimal rounding waste."""
    tn_target = max(128, _round_up(tn_target, 128))
    out_lane = _round_up(out_feat, 128)
    if out_lane <= tn_target:
        tn = out_lane
    else:
        n_n = _cdiv(out_lane, tn_target)
        tn = _round_up(_cdiv(out_lane, n_n), 128)
    out_p = _round_up(out_lane, tn)
    return tn, out_p


def _pick_tm(batch, tm_target, pack):
    """Batch tile: multiple of the sublane packing, ragged-friendly."""
    tm_target = max(pack, _round_up(tm_target, pack))
    if batch <= tm_target:
        tm = _round_up(batch, pack)
    else:
        n_m = _cdiv(batch, tm_target)
        tm = _round_up(_cdiv(batch, n_m), pack)
    return tm, _round_up(batch, tm)


def _fit_tiles(batch, in_feat, out_feat, has_res, x_bytes, w_bytes, o_bytes,
               tm_target, tn_target, pack, budget):
    """Pick (tm, tn) and padded dims, shrinking tiles until the working set fits VMEM."""
    tn_t, tm_t = tn_target, tm_target
    tm = tn = b_p = in_p = out_p = None
    for _ in range(32):
        tn, out_p = _pick_tn(out_feat, tn_t)
        in_p = out_p if has_res else in_feat
        tm, b_p = _pick_tm(batch, tm_t, pack)
        if _vmem_working_set(tm, tn, in_p, x_bytes, w_bytes, o_bytes) <= budget:
            break
        if tn > 128:
            tn_t = max(128, tn // 2)
        elif tm > pack:
            tm_t = max(pack, tm // 2)
        else:
            break  # can't shrink further; let the compiler try
    return tm, tn, b_p, in_p, out_p


def _make_kernel(act, leaky_slope, has_bias, tn):
    use_act = act not in (None, "identity")
    if use_act and act not in ("relu", "relu6", "leaky"):
        raise ValueError(f"unknown act {act!r}")

    def body(x_ref, w_ref, b_ref, o_ref):
        # MXU matmul with f32 accumulation; operands keep their input dtype.
        y = jnp.dot(x_ref[...], w_ref[...], preferred_element_type=jnp.float32)
        if b_ref is not None:
            y = y + b_ref[...]            # (tm, tn) + (1, tn) broadcast, f32
        if not use_act:
            o_ref[...] = y.astype(o_ref.dtype)
            return
        if act == "relu":
            a = jnp.maximum(y, 0.0)
        elif act == "relu6":
            a = jnp.clip(y, 0.0, 6.0)
        else:  # leaky
            a = jnp.where(y >= 0.0, y, leaky_slope * y)
        # Residual sliced from the x block already resident in VMEM: has_res forces
        # in_p == out_p and out_p % tn == 0, so the residual columns for output
        # tile j live at lane offset j*tn inside the (tm, in_p) x block.
        off = pl.multiple_of(pl.program_id(0) * tn, 128)
        xres = x_ref[:, pl.ds(off, tn)]
        o_ref[...] = (a + xres.astype(jnp.float32)).astype(o_ref.dtype)

    if has_bias:
        def kernel(x_ref, w_ref, b_ref, o_ref):
            body(x_ref, w_ref, b_ref, o_ref)
    else:
        def kernel(x_ref, w_ref, o_ref):
            body(x_ref, w_ref, None, o_ref)
    return kernel


def _ffn_pallas(xd, wd, bd, *, act, leaky_slope, tm, tn, out_dtype, vmem_limit):
    b_p, in_p = xd.shape
    _, out_p = wd.shape
    grid = (out_p // tn, b_p // tm)   # N outer, batch inner (weight slab stays resident)

    in_specs = [
        pl.BlockSpec((tm, in_p), lambda j, i: (i, 0)),   # x: full-K tile, varies with batch
        pl.BlockSpec((in_p, tn), lambda j, i: (0, j)),   # W: constant across inner axis
    ]
    args = [xd, wd]
    if bd is not None:
        args.append(bd)
        in_specs.append(pl.BlockSpec((1, tn), lambda j, i: (0, j)))

    # x is re-streamed once per N tile; count that in the advisory byte estimate.
    bytes_accessed = (
        grid[0] * b_p * in_p * xd.dtype.itemsize
        + in_p * out_p * wd.dtype.itemsize
        + (out_p * 4 if bd is not None else 0)
        + b_p * out_p * jnp.dtype(out_dtype).itemsize
    )
    cost = pl.CostEstimate(flops=int(2 * b_p * in_p * out_p),
                           transcendentals=0,
                           bytes_accessed=int(bytes_accessed))

    # Steer the megacore split onto the N axis (each TC owns half of W) whenever
    # there is more than one N tile; otherwise let it split the batch axis.
    dim_sem = ("parallel", "arbitrary") if grid[0] >= 2 else ("parallel", "parallel")

    kernel = _make_kernel(act, leaky_slope, bd is not None, tn)
    return pl.pallas_call(
        kernel,
        out_shape=jax.ShapeDtypeStruct((b_p, out_p), out_dtype),
        grid_spec=pltpu.PrefetchScalarGridSpec(
            num_scalar_prefetch=0,
            grid=grid,
            in_specs=in_specs,
            out_specs=pl.BlockSpec((tm, tn), lambda j, i: (i, j)),
        ),
        compiler_params=pltpu.CompilerParams(
            dimension_semantics=dim_sem,
            vmem_limit_bytes=vmem_limit,
        ),
        cost_estimate=cost,
    )(*args)


class FeedForwardLayer:
    """Pallas TPU FeedForwardLayer.

    y = x @ W + b                      (act is None / 'identity')
    y = act(x @ W + b) + x             (otherwise; requires in_feat == out_feat)

    Weight / bias padding (and the f32 bias cast) happen ONCE at construction; the
    per-call hot path only pads x when ragged and launches the kernel.
    """

    def __init__(self, w, b=None, *, act=None, leaky_slope=0.01,
                 tm=256, tn=1024, cast_to_bf16=False):
        if act not in (None, "identity", "relu", "relu6", "leaky"):
            raise ValueError(f"unknown act {act!r}")
        in_feat, out_feat = w.shape
        self.act = None if act in (None, "identity") else act
        self.has_res = self.act is not None
        if self.has_res and in_feat != out_feat:
            raise ValueError("residual path requires in_feat == out_feat")
        self.in_feat, self.out_feat = in_feat, out_feat
        self.leaky_slope = float(leaky_slope)
        self.tm_target = int(tm)
        self.cast_to_bf16 = bool(cast_to_bf16)
        self.vmem_budget = _vmem_budget_bytes()

        w_dtype = jnp.bfloat16 if (self.cast_to_bf16 and w.dtype == jnp.float32) else w.dtype
        w_bytes = jnp.dtype(w_dtype).itemsize
        pack = _sublane_pack(w_dtype)
        # Pick the lane tile (and padded K/N) assuming tm_target batch rows.
        _, self.tn, _, self.in_p, self.out_p = _fit_tiles(
            self.tm_target, in_feat, out_feat, self.has_res,
            w_bytes, w_bytes, w_bytes, self.tm_target, int(tn), pack, self.vmem_budget)

        # One-time weight / bias padding (hoisted out of the per-call path).
        wd = w.astype(w_dtype)
        if (self.in_p, self.out_p) != (in_feat, out_feat):
            wd = jnp.zeros((self.in_p, self.out_p), w_dtype).at[:in_feat, :out_feat].set(wd)
        self.wd = wd
        if b is not None:
            bd = b.reshape(1, out_feat).astype(jnp.float32)
            if self.out_p != out_feat:
                bd = jnp.zeros((1, self.out_p), jnp.float32).at[:, :out_feat].set(bd)
            self.bd = bd
        else:
            self.bd = None

    def __call__(self, x):
        batch, in_feat = x.shape
        if in_feat != self.in_feat:
            raise ValueError(f"expected {self.in_feat} input features, got {in_feat}")
        out_dtype = x.dtype
        x_dtype = jnp.bfloat16 if (self.cast_to_bf16 and x.dtype == jnp.float32) else x.dtype
        x_bytes = jnp.dtype(x_dtype).itemsize
        w_bytes = jnp.dtype(self.wd.dtype).itemsize
        o_bytes = jnp.dtype(out_dtype).itemsize
        pack = _sublane_pack(out_dtype)

        tm, b_p = _pick_tm(batch, self.tm_target, pack)
        # Shrink the batch tile if the working set would exceed the VMEM budget
        # (v7x has only 64 MiB VMEM; the lane tile was sized at construction).
        while (tm > pack and
               _vmem_working_set(tm, self.tn, self.in_p, x_bytes, w_bytes, o_bytes)
               > self.vmem_budget):
            tm = max(pack, _round_up(max(pack, tm // 2), pack))
            b_p = _round_up(batch, tm)

        xd = x.astype(x_dtype)
        if (b_p, self.in_p) != (batch, in_feat):
            xd = jnp.zeros((b_p, self.in_p), x_dtype).at[:batch, :in_feat].set(xd)

        out = _ffn_pallas(xd, self.wd, self.bd, act=self.act,
                          leaky_slope=self.leaky_slope, tm=tm, tn=self.tn,
                          out_dtype=out_dtype, vmem_limit=self.vmem_budget)
        if (b_p, self.out_p) != (batch, self.out_feat):
            out = out[:batch, :self.out_feat]
        return out


def feed_forward_layer(x, w, b=None, *, act=None, leaky_slope=0.01,
                       tm=256, tn=1024, cast_to_bf16=False):
    """One-shot functional wrapper (weight padding happens per call).
    For repeated calls with the same weights, build FeedForwardLayer once."""
    layer = FeedForwardLayer(w, b, act=act, leaky_slope=leaky_slope,
                             tm=tm, tn=tn, cast_to_bf16=cast_to_bf16)
    return layer(x)


def _reference(x, w, b, act, leaky_slope=0.01):
    y = x @ w
    if b is not None:
        y = y + b
    if act is None or act == "identity":
        return y
    if act == "relu":
        a = jnp.maximum(y, 0.0)
    elif act == "relu6":
        a = jnp.clip(y, 0.0, 6.0)
    elif act == "leaky":
        a = jnp.where(y >= 0.0, y, leaky_slope * y)
    else:
        raise ValueError(act)
    return a + x


if __name__ == "__main__":
    key = jax.random.PRNGKey(0)
    k_x, k_w, k_b, k_x2, k_w2, k_x3, k_w3, k_b3 = jax.random.split(key, 8)

    # Residual-friendly shape (in == out) with a ragged batch to exercise padding.
    batch, feat = 6, 32
    bound = 1.0 / jnp.sqrt(jnp.float32(feat))
    x = jax.random.normal(k_x, (batch, feat), jnp.float32)
    w = jax.random.uniform(k_w, (feat, feat), jnp.float32, -bound, bound)
    b = jax.random.uniform(k_b, (feat,), jnp.float32, -bound, bound)

    # Plain rectangular linear, no bias, no activation.
    in2, out2 = 32, 48
    x2 = jax.random.normal(k_x2, (batch, in2), jnp.float32)
    w2 = jax.random.uniform(k_w2, (in2, out2), jnp.float32, -bound, bound)

    # Wider residual case run with small tiles so the grid is (2, 2): exercises the
    # in-VMEM residual slice at a nonzero lane offset and ragged batch tiling.
    b3n, feat3 = 10, 256
    bound3 = 1.0 / jnp.sqrt(jnp.float32(feat3))
    x3 = jax.random.normal(k_x3, (b3n, feat3), jnp.float32)
    w3 = jax.random.uniform(k_w3, (feat3, feat3), jnp.float32, -bound3, bound3)
    b3 = jax.random.uniform(k_b3, (feat3,), jnp.float32, -bound3, bound3)

    cases = [
        (x, w, b, None, {}),        # linear + bias
        (x, w, b, "relu", {}),      # relu(linear) + residual
        (x, w, b, "relu6", {}),     # relu6(linear) + residual
        (x, w, b, "leaky", {}),     # leaky_relu(linear) + residual
        (x, w, None, "relu", {}),   # no bias + residual
        (x2, w2, None, None, {}),   # rectangular, no bias, no act
        (x3, w3, b3, "leaky", dict(tm=8, tn=128)),  # multi-tile grid + residual slice
    ]
    for xi, wi, bi, act, kw in cases:
        out = feed_forward_layer(xi, wi, bi, act=act, leaky_slope=0.01, **kw)
        jax.block_until_ready(out)
        ref = _reference(xi, wi, bi, act, 0.01)
        assert out.shape == ref.shape, f"shape mismatch for act={act}"
        assert jnp.allclose(out, ref, atol=1e-4, rtol=1e-4), f"value mismatch for act={act}"

    # Hoisted-weight (class) path: pad W/bias once, call on two different batches.
    layer = FeedForwardLayer(w, b, act="relu")
    for bs in (3, 9):
        xb = jax.random.normal(jax.random.PRNGKey(bs), (bs, feat), jnp.float32)
        out = layer(xb)
        jax.block_until_ready(out)
        ref = _reference(xb, w, b, "relu")
        assert jnp.allclose(out, ref, atol=1e-4, rtol=1e-4), "class-path mismatch"

    # Opt-in bf16 operand path (v5e MXU); f32 accumulation, looser tolerance.
    out_bf = feed_forward_layer(x, w, b, act="relu", cast_to_bf16=True)
    jax.block_until_ready(out_bf)
    ref_bf = _reference(x, w, b, "relu")
    assert jnp.allclose(out_bf, ref_bf, atol=5e-2, rtol=5e-2), "bf16 path mismatch"

    print("KERNEL_OK")
</pallas_src>

<mosaic_0001>
module attributes {stable_mosaic.version = 11 : i64} {
  func.func @kernel(%arg0: i32, %arg1: i32, %arg2: memref<8x32xf32, #tpu.memory_space<vmem>>, %arg3: memref<32x128xf32, #tpu.memory_space<vmem>>, %arg4: memref<1x128xf32, #tpu.memory_space<vmem>>, %arg5: memref<8x128xf32, #tpu.memory_space<vmem>>) attributes {dimension_semantics = [#tpu.dimension_semantics<parallel>, #tpu.dimension_semantics<parallel>], iteration_bounds = array<i64: 1, 1>, scalar_prefetch = 0 : i64, scratch_operands = 0 : i64, tpu.core_type = #tpu.core_type<tc>, window_params = [{transform_indices = @transform_0, window_bounds = array<i64: 8, 32>}, {transform_indices = @transform_1, window_bounds = array<i64: 32, 128>}, {transform_indices = @transform_2, window_bounds = array<i64: 1, 128>}, {transform_indices = @transform_3, window_bounds = array<i64: 8, 128>}]} {
    %c0 = arith.constant 0 : index
    %c0_0 = arith.constant 0 : index
    %0 = vector.load %arg2[%c0, %c0_0] : memref<8x32xf32, #tpu.memory_space<vmem>>, vector<8x32xf32>
    %c0_1 = arith.constant 0 : index
    %c0_2 = arith.constant 0 : index
    %1 = vector.load %arg3[%c0_1, %c0_2] : memref<32x128xf32, #tpu.memory_space<vmem>>, vector<32x128xf32>
    %cst = arith.constant dense<0.000000e+00> : vector<8x128xf32>
    %2 = tpu.matmul %0, %1, %cst {dimension_numbers = #tpu.dot_dimension_numbers<[1], [0], [0], [1], [0, 0, 1, 1], [], []>} : vector<8x32xf32>, vector<32x128xf32>, vector<8x128xf32> -> vector<8x128xf32>
    %c0_3 = arith.constant 0 : index
    %c0_4 = arith.constant 0 : index
    %3 = vector.load %arg4[%c0_3, %c0_4] : memref<1x128xf32, #tpu.memory_space<vmem>>, vector<1x128xf32>
    %4 = vector.broadcast %3 : vector<1x128xf32> to vector<8x128xf32>
    %5 = arith.addf %2, %4 : vector<8x128xf32>
    %c0_5 = arith.constant 0 : index
    %c0_6 = arith.constant 0 : index
    %6 = vector.load %arg5[%c0_5, %c0_6] : memref<8x128xf32, #tpu.memory_space<vmem>>, vector<8x128xf32>
    tpu.vector_store %arg5[%c0_5, %c0_6], %5 {strides = array<i32>} : memref<8x128xf32, #tpu.memory_space<vmem>>, vector<8x128xf32>,
    return
  }
  func.func @transform_0(%arg0: i32, %arg1: i32) -> (i32, i32) {
    %c0_i32 = arith.constant 0 : i32
    %c0_i32_0 = arith.constant 0 : i32
    return %arg1, %c0_i32 : i32, i32
  }
  func.func @transform_1(%arg0: i32, %arg1: i32) -> (i32, i32) {
    %c0_i32 = arith.constant 0 : i32
    %c0_i32_0 = arith.constant 0 : i32
    return %c0_i32, %arg0 : i32, i32
  }
  func.func @transform_2(%arg0: i32, %arg1: i32) -> (i32, i32) {
    %c0_i32 = arith.constant 0 : i32
    %c0_i32_0 = arith.constant 0 : i32
    return %c0_i32, %arg0 : i32, i32
  }
  func.func @transform_3(%arg0: i32, %arg1: i32) -> (i32, i32) {
    %c0_i32 = arith.constant 0 : i32
    return %arg1, %arg0 : i32, i32
  }
}

</mosaic_0001>

<bundles_post_ra>
// kernel: tpu_custom_call.1
= control target key start
LH: loop header
LB: loop body
LE: loop exit
PB: predicated region body
PF: predicated region fallthrough
CT: control target
= control target key end

     0   :  { %8 = vsyncpa [#allocation3], 0  ;;  %s322_s0 = inlined_call_operand.hbm [shape: f32[8,32], index: 0, kind: input, shape index: {}]   ;;  %s323_s1 = inlined_call_operand.hbm [shape: f32[32,128], index: 1, kind: input, shape index: {}]   ;;  %s324_s2 = inlined_call_operand.vmem [shape: f32[1,128], index: 2, kind: input, shape index: {}]   ;;  %s325_s3 = inlined_call_operand.hbm [shape: f32[8,128], index: 3, kind: output, shape index: {}]  }
   0x1   :  { %9 = vsyncpa [#allocation6], 0 }
   0x2   :  { %10 = vsyncpa [#allocation4], 0  ;;  %s248_s12 = smov [#allocation2]   ;;  %s249_s14 = smov [#allocation5]  }
   0x3   :  { %s17_s13 = sshll.u32 %s248_s12, 4  ;;  %s26_s15 = sshll.u32 %s249_s14, 4  ;;  %s18_s13 = int_to_ptr.vmem [resolvable:$true] %s17_s13  ;;  %s276_s15 = int_to_ptr.vmem [resolvable:$true] %s26_s15 }
   0x4   :  { %s176_s18 = scalar_lea.hbm %s322_s0, 128 }
   0x5   :  { %p177_p0 = scmp.ne.s32.totalorder %s322_s0, %s176_s18  ;;  %p180_p1 = scmp.lt.u32.totalorder %s176_s18, %s322_s0 }
   0x7   :  { %p182_p2 = pnand %p180_p1, %p177_p0 }
   0x9   :  { %185 = shalt.err (!%p182_p2)
}
   0xa   :  { %s186_s23 = scalar_lea.vmem %s18_s13, 128  ;;  %p191_p4 = scmp.lt.s32.totalorder %s18_s13, %s18_s13 }
   0xb   :  { %p187_p3 = scmp.ne.s32.totalorder %s18_s13, %s186_s23  ;;  %p192_p5 = scmp.lt.s32.totalorder %s186_s23, %s186_s23 }
   0xd   :  { %p193_p6 = por %p192_p5, %p191_p4 }
   0xf   :  { %p194_p7 = pnand %p193_p6, %p187_p3 }
  0x11   :  { %197 = shalt.err (!%p194_p7)
}
  0x12   :  { %20 = dma.hbm_to_vmem [thread:$0]  %s322_s0, 128, %s18_s13, [#allocation3]  }
  0x13   :  { %s198_s28 = scalar_lea.hbm %s323_s1, 512 }
  0x14   :  { %p199_p8 = scmp.ne.s32.totalorder %s323_s1, %s198_s28  ;;  %p202_p9 = scmp.lt.u32.totalorder %s198_s28, %s323_s1 }
  0x16   :  { %p204_p10 = pnand %p202_p9, %p199_p8 }
  0x18   :  { %207 = shalt.err (!%p204_p10)
}
  0x19   :  { %s208_s6 = scalar_lea.vmem %s276_s15, 512  ;;  %p213_p12 = scmp.lt.s32.totalorder %s276_s15, %s276_s15 }
  0x1a   :  { %p209_p11 = scmp.ne.s32.totalorder %s276_s15, %s208_s6  ;;  %p214_p13 = scmp.lt.s32.totalorder %s208_s6, %s208_s6 }
  0x1c   :  { %p215_p0 = por %p214_p13, %p213_p12 }
  0x1e   :  { %p216_p1 = pnand %p215_p0, %p209_p11 }
  0x20   :  { %219 = shalt.err (!%p216_p1)
}
  0x21   :  { %s250_s0 = smov 128   ;;  %s251_s7 = smov 8  }
  0x22   :  { %32 = dma.hbm_to_vmem [thread:$0]  %s323_s1, 512, %s276_s15, [#allocation6], %s250_s0, %s250_s0, %s251_s7  }
  0x23   :  { %242 = dma.done.wait [#allocation3], 128  }
  0x24   :  { %243 = vsyncadd [#allocation3], 4294967168 }
  0x25   :  { %244 = dma.done.wait [#allocation6], 512  }
  0x26   :  { %245 = vsyncadd [#allocation6], 4294966784  ;;  %v252_v0 = vmov 0.0|0.0   ;;  %vm253_vm0 = vmmov 0   ;;  %v254_v1 = vmov 0.0   ;;  %v42_v2 = vld [vmem:[#allocation5] sm:$0xff] }
  0x27   :  { %162 = vmatprep.subr.bf16.mxu0 %v252_v0  ;;  %159 = vmatprep.mubr.msk.f32.mxu0 %vm253_vm0, %v254_v1  ;;  %v43_v3 = vld [vmem:[#allocation5 + $0x8] sm:$0xff]  ;;  %v44_v4 = vld [vmem:[#allocation5 + $0x10] sm:$0xff]  ;;  %v45_v6 = vld [vmem:[#allocation5 + $0x18] sm:$0xff]  ;;  %vm53_vm1 = vcmask 261120   ;;  %s255_s11 = smov [#allocation7]  }
  0x28   :  { %v163_v5 = vpack.c.bf16 %v43_v3, %v42_v2  ;;  %v166_v7 = vpack.c.bf16 %v45_v6, %v44_v4  ;;  %v41_v8 = vld [vmem:[#allocation2] sm:$0xff]  ;;  %s134_s12 = sshll.u32 %s255_s11, 4  ;;  %s135_s12 = int_to_ptr.vmem [resolvable:$true] %s134_s12 }
  0x29   :  { %v144_v9 = vld [vmem:[%s324_s2] ss:$0 sm:$0xff]  ;;  %s220_s13 = scalar_lea.vmem %s135_s12, 128  ;;  %p225_p3 = scmp.lt.s32.totalorder %s135_s12, %s135_s12 }
  0x2a   :  { %164 = vmatpush3.bf16.msra.mxu0 %v163_v5  ;;  %p221_p2 = scmp.ne.s32.totalorder %s135_s12, %s220_s13  ;;  %p226_p4 = scmp.lt.s32.totalorder %s220_s13, %s220_s13 }
  0x2b   :  { %165 = vmatprep.subr.bf16.mxu0 %v252_v0 }
  0x2c   :  { %p227_p5 = por %p226_p4, %p225_p3 }
  0x2e   :  { %167 = vmatpush3.bf16.msra.mxu0 %v166_v7  ;;  %p228_p6 = pnand %p227_p5, %p221_p2 }
  0x31   :  { %160 = vmatmul.mubr.msk.f32.vlgmr.msra.gmra.mrb[0].mxu0 %vm53_vm1, %v41_v8 }
 0x104   :  { %v123_v10 = vpop.f32.mrb[0].mxu0 }
 0x105   :  { %v124_v11 = vadd.f32 %v144_v9, %v123_v10  ;;  %v161_v12 = vpop.f32.mrb[1].mxu0 }
 0x107   :  { %127 = vst [vmem:[#allocation7] sm:$0xff] %v124_v11 }
 0x108   :  { %231 = shalt.err (!%p228_p6)
}
 0x109   :  { %s232_s16 = scalar_lea.hbm %s325_s3, 128 }
 0x10a   :  { %p233_p7 = scmp.ne.s32.totalorder %s325_s3, %s232_s16  ;;  %p236_p8 = scmp.lt.u32.totalorder %s232_s16, %s325_s3 }
 0x10c   :  { %p238_p9 = pnand %p236_p8, %p233_p7 }
 0x10e   :  { %241 = shalt.err (!%p238_p9)
}
 0x10f   :  { %137 = dma.vmem_to_hbm [thread:$0]  %s135_s12, 128, %s325_s3, [#allocation4]  }
 0x110   :  { %246 = dma.done.wait [#allocation4], 128  }
 0x111   :  { %247 = vsyncadd [#allocation4], 4294967168 }
 0x112   :  { %141 = vsyncpa [#allocation3], 1 }
 0x113   :  { %142 = vsyncpa [#allocation6], 1 }
 0x114   :  { %143 = vsyncpa [#allocation4], 1 }

</bundles_post_ra>
